<compile_context>
chip_gen: v6e
topology: v6e:2x2x1
jax: 0.10.0
libtpu: 0.0.40
codegen_flags: <defaults>
</compile_context>

<pallas_src>
import functools

import jax
import jax.numpy as jnp
import numpy as np
from jax.experimental import pallas as pl
from jax.experimental.pallas import tpu as pltpu


def _dc_kernel(inv_scale, var_scale, cov_scale, inv_bm1,
               in_ref, acc_ref, gram_ref):
    """Grid: (feature-split 'parallel', feature-tile 'arbitrary').

    in_ref   : (2, B, tile_d)   input block; [0] = x rows, [1] = y rows.
    acc_ref  : (1, 1, tile_d)   per-split vector accumulator (output).
    gram_ref : (1, 2, B, B)     per-split gram accumulators Gx, Gy (output).
    """
    k = pl.program_id(1)

    @pl.when(k == 0)
    def _init():
        acc_ref[...] = jnp.zeros_like(acc_ref)
        gram_ref[...] = jnp.zeros_like(gram_ref)

    xb = in_ref[0].astype(jnp.float32)                      # (B, tile_d)
    yb = in_ref[1].astype(jnp.float32)

    # ---- invariance term: per-column sum of squared differences ---------------
    d = xb - yb
    inv_col = jnp.sum(d * d, axis=0, keepdims=True)         # (1, tile_d)

    # ---- centering is per feature column, so each D-tile sees the full batch --
    xc = xb - jnp.mean(xb, axis=0, keepdims=True)
    yc = yb - jnp.mean(yb, axis=0, keepdims=True)

    ssq_x = jnp.sum(xc * xc, axis=0, keepdims=True)         # diag of x_c^T x_c (this tile)
    ssq_y = jnp.sum(yc * yc, axis=0, keepdims=True)

    # ---- variance hinge: sqrt only on the small (1, tile_d) vectors (EUP) -----
    std_x = jnp.sqrt(ssq_x * inv_bm1 + 1e-4)
    std_y = jnp.sqrt(ssq_y * inv_bm1 + 1e-4)
    var_col = jnp.maximum(1.0 - std_x, 0.0) + jnp.maximum(1.0 - std_y, 0.0)

    # ---- diagonal of the (D, D) covariance numerator, squared (subtracted now) -
    diag_col = ssq_x * ssq_x + ssq_y * ssq_y

    # Single vector accumulator: pure VPU elementwise adds, no per-step scalar
    # reductions.  Scalarized once, in the wrapper.
    contrib = inv_scale * inv_col + var_scale * var_col - cov_scale * diag_col
    acc_ref[...] += contrib[None]

    # ---- (B, B) gram accumulation on the MXU (bf16 operands, f32 accumulate):
    #      ||X_c^T X_c||_F^2 == ||X_c X_c^T||_F^2, so (D, D) is never formed. ----
    xh = xc.astype(jnp.bfloat16)
    yh = yc.astype(jnp.bfloat16)
    gram_ref[0, 0, :, :] += jax.lax.dot_general(
        xh, xh, (((1,), (1,)), ((), ())), preferred_element_type=jnp.float32)
    gram_ref[0, 1, :, :] += jax.lax.dot_general(
        yh, yh, (((1,), (1,)), ((), ())), preferred_element_type=jnp.float32)


def _pick_tile_d(D, B, in_itemsize, budget_bytes):
    """Largest tile_d (multiple of 128 dividing D) whose working set fits VMEM."""
    def est(td):
        inp = 2 * (2 * B * td) * in_itemsize          # double-buffered input block
        temps = 4 * (2 * B * td) * 4                  # in-kernel f32/bf16 temporaries
        outs = 2 * (td * 4 + 2 * B * B * 4)           # acc + gram output blocks
        return inp + temps + outs + (1 << 20)         # 1 MiB slack
    cands = [m * 128 for m in range(D // 128, 0, -1) if D % (m * 128) == 0]
    if not cands:
        return D
    for td in cands:
        if est(td) <= budget_bytes:
            return td
    return cands[-1]


def dc_loss(inputs, targets=None, *, batch_size=None,
            inv_coeff=25.0, var_coeff=25.0, cov_coeff=1.0, tile_d=None):
    """inputs: (2B, D) array (any float dtype). targets: unused by DC.forward."""
    total, D = inputs.shape
    assert total % 2 == 0, "inputs must stack two equal views along dim 0"
    B = total // 2
    assert B >= 2, "DC loss needs >= 2 samples per view (unbiased variance)"
    if batch_size is None:
        batch_size = B
    num_features = float(8192) ** 3                    # as in the spec

    # Static per-term scales (computed in double precision, baked into the kernel).
    inv_scale = float(inv_coeff) / float(B * D)
    var_scale = float(var_coeff) / float(2 * D)
    cov_scale = float(cov_coeff) / (float(batch_size - 1) ** 2 * num_features)
    inv_bm1 = 1.0 / float(B - 1)

    # ---- VMEM-budget-aware tiling --------------------------------------------
    try:
        info = pltpu.get_tpu_info()
        vmem_cap = int(getattr(info, "vmem_capacity_bytes", 64 << 20))
    except Exception:                                   # pragma: no cover
        vmem_cap = 64 << 20                             # v7x per-core physical VMEM
    budget = (vmem_cap * 3) // 4                        # leave headroom

    in_itemsize = jnp.dtype(inputs.dtype).itemsize
    if tile_d is None:
        tile_d = _pick_tile_d(D, B, in_itemsize, budget)
    assert D % tile_d == 0, "tile_d must divide the feature dimension"
    n_tiles = D // tile_d

    # Two-way feature split across TensorCores (v7x megacore).  Single-core chips
    # simply run the 'parallel' axis serially.
    num_splits = 2 if (n_tiles % 2 == 0 and n_tiles >= 2) else 1
    nps = n_tiles // num_splits

    kernel = functools.partial(_dc_kernel, inv_scale, var_scale, cov_scale, inv_bm1)

    # Free view: keeps the x/y split sublane-clean for any B.
    x3 = inputs.reshape(2, B, D)

    acc_vec, gram = pl.pallas_call(
        kernel,
        out_shape=(jax.ShapeDtypeStruct((num_splits, 1, tile_d), jnp.float32),
                   jax.ShapeDtypeStruct((num_splits, 2, B, B), jnp.float32)),
        grid_spec=pltpu.PrefetchScalarGridSpec(
            num_scalar_prefetch=0,
            grid=(num_splits, nps),
            in_specs=[pl.BlockSpec((2, B, tile_d),
                                   lambda c, k: (0, 0, c * nps + k))],
            out_specs=(pl.BlockSpec((1, 1, tile_d), lambda c, k: (c, 0, 0)),
                       pl.BlockSpec((1, 2, B, B), lambda c, k: (c, 0, 0, 0)))),
        compiler_params=pltpu.CompilerParams(
            dimension_semantics=("parallel", "arbitrary"),
            vmem_limit_bytes=int(budget)),
    )(x3)

    # Tiny cross-split combine in plain XLA (few hundred elements at most).
    sep = jnp.sum(acc_vec)                 # inv + var - cov_diagonal terms, pre-scaled
    g = jnp.sum(gram, axis=0)              # (2, B, B): total Gx, Gy over all of D
    fro = jnp.sum(g * g)                   # ||Gx||_F^2 + ||Gy||_F^2
    return sep + jnp.float32(cov_scale) * fro


def _reference(inputs, batch_size, inv_coeff, var_coeff, cov_coeff):
    """Pure numpy (float64) mirror of DC.forward."""
    inputs = np.asarray(inputs, dtype=np.float64)
    B = inputs.shape[0] // 2
    x, y = inputs[:B], inputs[B:]
    inv_loss = np.mean((x - y) ** 2)
    x = x - x.mean(axis=0)
    y = y - y.mean(axis=0)
    std_x = np.sqrt(x.var(axis=0, ddof=1) + 1e-4)
    std_y = np.sqrt(y.var(axis=0, ddof=1) + 1e-4)
    var_loss = np.mean(np.maximum(1.0 - std_x, 0.0)) / 2 + \
               np.mean(np.maximum(1.0 - std_y, 0.0)) / 2
    cov_x = x.T @ x / (batch_size - 1)
    cov_y = y.T @ y / (batch_size - 1)

    def off_diag_sq(c):
        return (c ** 2).sum() - (np.diag(c) ** 2).sum()

    num_features = 8192.0 ** 3
    cov_loss = off_diag_sq(cov_x) / num_features + off_diag_sq(cov_y) / num_features
    return inv_coeff * inv_loss + var_coeff * var_loss + cov_coeff * cov_loss


if __name__ == "__main__":
    key = jax.random.PRNGKey(0)

    B = 8            # per-view batch (x and y each have B rows)
    D = 512          # feature dim; tile_d=128 -> 4 tiles = 2 splits x 2 steps
    inputs = jax.random.normal(key, (2 * B, D), dtype=jnp.float32)
    targets = jnp.zeros((2 * B,), dtype=jnp.int32)   # unused by DC.forward

    inv_c, var_c, cov_c = 25.0, 25.0, 1.0
    loss = dc_loss(inputs, targets, batch_size=B,
                   inv_coeff=inv_c, var_coeff=var_c, cov_coeff=cov_c, tile_d=128)
    loss = jax.block_until_ready(loss)

    ref = _reference(np.array(inputs), B, inv_c, var_c, cov_c)
    assert np.allclose(float(loss), ref, rtol=1e-4, atol=1e-6), (float(loss), ref)

    print("KERNEL_OK")
</pallas_src>

<mosaic_0001>
module attributes {stable_mosaic.version = 11 : i64} {
  func.func @_dc_kernel(%arg0: i32, %arg1: i32, %arg2: memref<2x8x128xf32, #tpu.memory_space<vmem>>, %arg3: memref<1x1x128xf32, #tpu.memory_space<vmem>>, %arg4: memref<1x2x8x8xf32, #tpu.memory_space<vmem>>) attributes {dimension_semantics = [#tpu.dimension_semantics<parallel>, #tpu.dimension_semantics<arbitrary>], iteration_bounds = array<i64: 2, 2>, scalar_prefetch = 0 : i64, scratch_operands = 0 : i64, tpu.core_type = #tpu.core_type<tc>, window_params = [{transform_indices = @transform_0, window_bounds = array<i64: 2, 8, 128>}, {transform_indices = @transform_1, window_bounds = array<i64: 1, 1, 128>}, {transform_indices = @transform_2, window_bounds = array<i64: 1, 2, 8, 8>}]} {
    %c0_i32 = arith.constant 0 : i32
    %0 = arith.cmpi eq, %arg1, %c0_i32 : i32
    %1 = arith.extui %0 : i1 to i32
    %c0_i32_0 = arith.constant 0 : i32
    %2 = arith.cmpi ne, %1, %c0_i32_0 : i32
    scf.if %2 {
      %cst_46 = arith.constant 0.000000e+00 : f32
      %79 = vector.broadcast %cst_46 : f32 to vector<1x1x128xf32>
      %c0_47 = arith.constant 0 : index
      %c0_48 = arith.constant 0 : index
      %c0_49 = arith.constant 0 : index
      %80 = vector.load %arg3[%c0_47, %c0_48, %c0_49] : memref<1x1x128xf32, #tpu.memory_space<vmem>>, vector<1x1x128xf32>
      tpu.vector_store %arg3[%c0_47, %c0_48, %c0_49], %79 {strides = array<i32>} : memref<1x1x128xf32, #tpu.memory_space<vmem>>, vector<1x1x128xf32>,
      %cst_50 = arith.constant 0.000000e+00 : f32
      %81 = vector.broadcast %cst_50 : f32 to vector<1x2x8x8xf32>
      %c0_51 = arith.constant 0 : index
      %c0_52 = arith.constant 0 : index
      %c0_53 = arith.constant 0 : index
      %c0_54 = arith.constant 0 : index
      %82 = vector.load %arg4[%c0_51, %c0_52, %c0_53, %c0_54] : memref<1x2x8x8xf32, #tpu.memory_space<vmem>>, vector<1x2x8x8xf32>
      tpu.vector_store %arg4[%c0_51, %c0_52, %c0_53, %c0_54], %81 {strides = array<i32>} : memref<1x2x8x8xf32, #tpu.memory_space<vmem>>, vector<1x2x8x8xf32>,
    } else {
    }
    %c0 = arith.constant 0 : index
    %c0_1 = arith.constant 0 : index
    %c0_2 = arith.constant 0 : index
    %3 = vector.load %arg2[%c0, %c0_1, %c0_2] : memref<2x8x128xf32, #tpu.memory_space<vmem>>, vector<1x8x128xf32>
    %4 = vector.shape_cast %3 : vector<1x8x128xf32> to vector<8x128xf32>
    %c1 = arith.constant 1 : index
    %c0_3 = arith.constant 0 : index
    %c0_4 = arith.constant 0 : index
    %5 = vector.load %arg2[%c1, %c0_3, %c0_4] : memref<2x8x128xf32, #tpu.memory_space<vmem>>, vector<1x8x128xf32>
    %6 = vector.shape_cast %5 : vector<1x8x128xf32> to vector<8x128xf32>
    %7 = arith.subf %4, %6 : vector<8x128xf32>
    %8 = arith.mulf %7, %7 : vector<8x128xf32>
    %cst = arith.constant dense<0.000000e+00> : vector<128xf32>
    %9 = vector.multi_reduction <add>, %8, %cst [0] : vector<8x128xf32> to vector<128xf32>
    %10 = vector.shape_cast %9 : vector<128xf32> to vector<1x128xf32>
    %cst_5 = arith.constant dense<0.000000e+00> : vector<128xf32>
    %11 = vector.multi_reduction <add>, %4, %cst_5 [0] : vector<8x128xf32> to vector<128xf32>
    %12 = vector.shape_cast %11 : vector<128xf32> to vector<1x128xf32>
    %cst_6 = arith.constant 8.000000e+00 : f32
    %13 = vector.broadcast %cst_6 : f32 to vector<1x128xf32>
    %14 = arith.divf %12, %13 : vector<1x128xf32>
    %15 = vector.broadcast %14 : vector<1x128xf32> to vector<8x128xf32>
    %16 = arith.subf %4, %15 : vector<8x128xf32>
    %cst_7 = arith.constant dense<0.000000e+00> : vector<128xf32>
    %17 = vector.multi_reduction <add>, %6, %cst_7 [0] : vector<8x128xf32> to vector<128xf32>
    %18 = vector.shape_cast %17 : vector<128xf32> to vector<1x128xf32>
    %cst_8 = arith.constant 8.000000e+00 : f32
    %19 = vector.broadcast %cst_8 : f32 to vector<1x128xf32>
    %20 = arith.divf %18, %19 : vector<1x128xf32>
    %21 = vector.broadcast %20 : vector<1x128xf32> to vector<8x128xf32>
    %22 = arith.subf %6, %21 : vector<8x128xf32>
    %23 = arith.mulf %16, %16 : vector<8x128xf32>
    %cst_9 = arith.constant dense<0.000000e+00> : vector<128xf32>
    %24 = vector.multi_reduction <add>, %23, %cst_9 [0] : vector<8x128xf32> to vector<128xf32>
    %25 = vector.shape_cast %24 : vector<128xf32> to vector<1x128xf32>
    %26 = arith.mulf %22, %22 : vector<8x128xf32>
    %cst_10 = arith.constant dense<0.000000e+00> : vector<128xf32>
    %27 = vector.multi_reduction <add>, %26, %cst_10 [0] : vector<8x128xf32> to vector<128xf32>
    %28 = vector.shape_cast %27 : vector<128xf32> to vector<1x128xf32>
    %cst_11 = arith.constant 0.142857149 : f32
    %29 = vector.broadcast %cst_11 : f32 to vector<1x128xf32>
    %30 = arith.mulf %25, %29 : vector<1x128xf32>
    %cst_12 = arith.constant 9.99999974E-5 : f32
    %31 = vector.broadcast %cst_12 : f32 to vector<1x128xf32>
    %32 = arith.addf %30, %31 : vector<1x128xf32>
    %33 = math.sqrt %32 : vector<1x128xf32>
    %cst_13 = arith.constant 0.142857149 : f32
    %34 = vector.broadcast %cst_13 : f32 to vector<1x128xf32>
    %35 = arith.mulf %28, %34 : vector<1x128xf32>
    %cst_14 = arith.constant 9.99999974E-5 : f32
    %36 = vector.broadcast %cst_14 : f32 to vector<1x128xf32>
    %37 = arith.addf %35, %36 : vector<1x128xf32>
    %38 = math.sqrt %37 : vector<1x128xf32>
    %cst_15 = arith.constant 1.000000e+00 : f32
    %39 = vector.broadcast %cst_15 : f32 to vector<1x128xf32>
    %40 = arith.subf %39, %33 : vector<1x128xf32>
    %cst_16 = arith.constant 0.000000e+00 : f32
    %41 = vector.broadcast %cst_16 : f32 to vector<1x128xf32>
    %42 = arith.maximumf %40, %41 : vector<1x128xf32>
    %cst_17 = arith.constant 1.000000e+00 : f32
    %43 = vector.broadcast %cst_17 : f32 to vector<1x128xf32>
    %44 = arith.subf %43, %38 : vector<1x128xf32>
    %cst_18 = arith.constant 0.000000e+00 : f32
    %45 = vector.broadcast %cst_18 : f32 to vector<1x128xf32>
    %46 = arith.maximumf %44, %45 : vector<1x128xf32>
    %47 = arith.addf %42, %46 : vector<1x128xf32>
    %48 = arith.mulf %25, %25 : vector<1x128xf32>
    %49 = arith.mulf %28, %28 : vector<1x128xf32>
    %50 = arith.addf %48, %49 : vector<1x128xf32>
    %cst_19 = arith.constant 0.00610351563 : f32
    %51 = vector.broadcast %cst_19 : f32 to vector<1x128xf32>
    %52 = arith.mulf %51, %10 : vector<1x128xf32>
    %cst_20 = arith.constant 0.0244140625 : f32
    %53 = vector.broadcast %cst_20 : f32 to vector<1x128xf32>
    %54 = arith.mulf %53, %47 : vector<1x128xf32>
    %55 = arith.addf %52, %54 : vector<1x128xf32>
    %cst_21 = arith.constant 3.7122232E-14 : f32
    %56 = vector.broadcast %cst_21 : f32 to vector<1x128xf32>
    %57 = arith.mulf %56, %50 : vector<1x128xf32>
    %58 = arith.subf %55, %57 : vector<1x128xf32>
    %c0_22 = arith.constant 0 : index
    %c0_23 = arith.constant 0 : index
    %c0_24 = arith.constant 0 : index
    %59 = vector.load %arg3[%c0_22, %c0_23, %c0_24] : memref<1x1x128xf32, #tpu.memory_space<vmem>>, vector<1x1x128xf32>
    %60 = vector.shape_cast %58 : vector<1x128xf32> to vector<1x1x128xf32>
    %61 = arith.addf %59, %60 : vector<1x1x128xf32>
    %c0_25 = arith.constant 0 : index
    %c0_26 = arith.constant 0 : index
    %c0_27 = arith.constant 0 : index
    %62 = vector.load %arg3[%c0_25, %c0_26, %c0_27] : memref<1x1x128xf32, #tpu.memory_space<vmem>>, vector<1x1x128xf32>
    tpu.vector_store %arg3[%c0_25, %c0_26, %c0_27], %61 {strides = array<i32>} : memref<1x1x128xf32, #tpu.memory_space<vmem>>, vector<1x1x128xf32>,
    %63 = arith.truncf %16 : vector<8x128xf32> to vector<8x128xbf16>
    %64 = arith.truncf %22 : vector<8x128xf32> to vector<8x128xbf16>
    %c0_28 = arith.constant 0 : index
    %c0_29 = arith.constant 0 : index
    %c0_30 = arith.constant 0 : index
    %c0_31 = arith.constant 0 : index
    %65 = vector.load %arg4[%c0_28, %c0_29, %c0_30, %c0_31] : memref<1x2x8x8xf32, #tpu.memory_space<vmem>>, vector<1x1x8x8xf32>
    %66 = vector.shape_cast %65 : vector<1x1x8x8xf32> to vector<8x8xf32>
    %cst_32 = arith.constant dense<0.000000e+00> : vector<8x8xf32>
    %67 = tpu.matmul %63, %63, %cst_32 {dimension_numbers = #tpu.dot_dimension_numbers<[1], [1], [0], [0], [0, 0, 1, 0], [], []>} : vector<8x128xbf16>, vector<8x128xbf16>, vector<8x8xf32> -> vector<8x8xf32>
    %68 = arith.addf %66, %67 : vector<8x8xf32>
    %c0_33 = arith.constant 0 : index
    %c0_34 = arith.constant 0 : index
    %c0_35 = arith.constant 0 : index
    %c0_36 = arith.constant 0 : index
    %69 = vector.load %arg4[%c0_33, %c0_34, %c0_35, %c0_36] : memref<1x2x8x8xf32, #tpu.memory_space<vmem>>, vector<1x1x8x8xf32>
    %70 = vector.shape_cast %69 : vector<1x1x8x8xf32> to vector<8x8xf32>
    %71 = vector.shape_cast %68 : vector<8x8xf32> to vector<1x1x8x8xf32>
    tpu.vector_store %arg4[%c0_33, %c0_34, %c0_35, %c0_36], %71 {strides = array<i32>} : memref<1x2x8x8xf32, #tpu.memory_space<vmem>>, vector<1x1x8x8xf32>,
    %c0_37 = arith.constant 0 : index
    %c1_38 = arith.constant 1 : index
    %c0_39 = arith.constant 0 : index
    %c0_40 = arith.constant 0 : index
    %72 = vector.load %arg4[%c0_37, %c1_38, %c0_39, %c0_40] : memref<1x2x8x8xf32, #tpu.memory_space<vmem>>, vector<1x1x8x8xf32>
    %73 = vector.shape_cast %72 : vector<1x1x8x8xf32> to vector<8x8xf32>
    %cst_41 = arith.constant dense<0.000000e+00> : vector<8x8xf32>
    %74 = tpu.matmul %64, %64, %cst_41 {dimension_numbers = #tpu.dot_dimension_numbers<[1], [1], [0], [0], [0, 0, 1, 0], [], []>} : vector<8x128xbf16>, vector<8x128xbf16>, vector<8x8xf32> -> vector<8x8xf32>
    %75 = arith.addf %73, %74 : vector<8x8xf32>
    %c0_42 = arith.constant 0 : index
    %c1_43 = arith.constant 1 : index
    %c0_44 = arith.constant 0 : index
    %c0_45 = arith.constant 0 : index
    %76 = vector.load %arg4[%c0_42, %c1_43, %c0_44, %c0_45] : memref<1x2x8x8xf32, #tpu.memory_space<vmem>>, vector<1x1x8x8xf32>
    %77 = vector.shape_cast %76 : vector<1x1x8x8xf32> to vector<8x8xf32>
    %78 = vector.shape_cast %75 : vector<8x8xf32> to vector<1x1x8x8xf32>
    tpu.vector_store %arg4[%c0_42, %c1_43, %c0_44, %c0_45], %78 {strides = array<i32>} : memref<1x2x8x8xf32, #tpu.memory_space<vmem>>, vector<1x1x8x8xf32>,
    return
  }
  func.func @transform_0(%arg0: i32, %arg1: i32) -> (i32, i32, i32) {
    %c2_i32 = arith.constant 2 : i32
    %0 = arith.muli %arg0, %c2_i32 : i32
    %1 = arith.addi %0, %arg1 : i32
    %c0_i32 = arith.constant 0 : i32
    %c0_i32_0 = arith.constant 0 : i32
    %c0_i32_1 = arith.constant 0 : i32
    return %c0_i32, %c0_i32_0, %1 : i32, i32, i32
  }
  func.func @transform_1(%arg0: i32, %arg1: i32) -> (i32, i32, i32) {
    %c0_i32 = arith.constant 0 : i32
    %c0_i32_0 = arith.constant 0 : i32
    %c0_i32_1 = arith.constant 0 : i32
    return %arg0, %c0_i32, %c0_i32_0 : i32, i32, i32
  }
  func.func @transform_2(%arg0: i32, %arg1: i32) -> (i32, i32, i32, i32) {
    %c0_i32 = arith.constant 0 : i32
    %c0_i32_0 = arith.constant 0 : i32
    %c0_i32_1 = arith.constant 0 : i32
    %c0_i32_2 = arith.constant 0 : i32
    return %arg0, %c0_i32, %c0_i32_0, %c0_i32_1 : i32, i32, i32, i32
  }
}

</mosaic_0001>

<bundles_post_ra>
// kernel: tpu_custom_call.1
= control target key start
LH: loop header
LB: loop body
LE: loop exit
PB: predicated region body
PF: predicated region fallthrough
CT: control target
= control target key end

     0   :  { %8 = vsyncpa [#allocation3], 0  ;;  %s1111_s0 = inlined_call_operand.hbm [shape: f32[2,8,512], index: 0, kind: input, shape index: {}]   ;;  %s1112_s1 = inlined_call_operand.hbm [shape: f32[2,1,128], index: 1, kind: output, shape index: {0}]   ;;  %s1113_s2 = inlined_call_operand.hbm [shape: f32[2,2,8,8], index: 2, kind: output, shape index: {1}]  }
   0x1   :  { %10 = vsyncpa [#allocation3 + $0x1], 0 }
   0x2   :  { %11 = vsyncpa [#allocation4], 0 }
   0x3   :  { %13 = vsyncpa [#allocation4 + $0x1], 0 }
   0x4   :  { %14 = vsyncpa [#allocation7], 0 }
   0x5   :  { %16 = vsyncpa [#allocation7 + $0x1], 0  ;;  %s875_s9 = smov 0   ;;  %s877_s10 = smov 0  }
   0x6   :  { %s879_s11 = smov 0   ;;  %s881_s12 = smov 0  }
   0x7   :  { %s883_s13 = smov 0   ;;  %s885_s14 = smov 0  }
   0x8   :  { %s887_s15 = smov 0   ;;  %s889_s16 = smov 0  }
   0x9   :  { %s891_s17 = smov 0   ;;  %s893_s18 = smov 0  }
   0xa   :  { %s895_s19 = smov 0  }
   0xb LB: > { %s511_s20 = sadd.s32 4294967295, %s847_s19   ;;  %s512_s21 = sadd.s32 4294967294, %s847_s19   ;;  %s847_s19 = sphi %s895_s19, %s22_s19   ;;  %s843_s18 = sphi %s893_s18, %s1134_s18   ;;  %s839_s17 = sphi %s891_s17, %s1133_s17   ;;  %s835_s16 = sphi %s889_s16, %s1132_s16   ;;  %s831_s15 = sphi %s887_s15, %s1131_s15   ;;  %s827_s14 = sphi %s885_s14, %s1130_s14   ;;  %s823_s13 = sphi %s883_s13, %s1129_s13   ;;  %s819_s12 = sphi %s881_s12, %s1128_s12   ;;  %s815_s11 = sphi %s879_s11, %s1127_s11   ;;  %s811_s10 = sphi %s877_s10, %s1126_s10   ;;  %s807_s9 = sphi %s875_s9, %s1125_s9  }
   0xc   : > { %s31_s22 = sadd.s32 1, %s839_s17  ;;  %s34_s23 = sadd.s32 1, %s843_s18 }
   0xd   : > { %p32_p0 = scmp.ge.s32.totalorder %s31_s22, 2  ;;  %s513_s24 = sshll.u32 %s843_s18, 1 }
   0xe   : > { %s934_s25 = sadd.s32 %s839_s17, %s513_s24  ;;  %s45_s26 = sadd.s32 1, %s827_s14 }
   0xf   : > { %s1136_s22 = smov (%p32_p0, %s31_s22), 0  ;;  %s1138_s23 = smov (!%p32_p0, %s34_s23), %s843_s18 }
  0x10   : > { %1116 = sst [smem:[#allocation11_spill]] %s1136_s22  ;;  %p52_p1 = scmp.ne.s32.totalorder %s827_s14, %s823_s13 }
  0x11   : > { %p53_p2 = scmp.eq.s32.totalorder %s847_s19, 0  ;;  %p36_p3 = scmp.ge.s32.totalorder %s1138_s23, 2 }
  0x12   : > { %p58_p4 = scmp.ne.s32.totalorder %s823_s13, %s819_s12  ;;  %p59_p6 = scmp.eq.s32.totalorder %s511_s20, 0 }
  0x13   : > { %p944_p5 = por %p53_p2, %p52_p1  ;;  %s1140_s23 = smov (%p36_p3, %s1138_s23), 0 }
  0x14   : > { %1118 = sst [smem:[#allocation12_spill]] %s1140_s23  ;;  %p950_p7 = por %p59_p6, %p58_p4 }
  0x15   : > { %s71_s29 = sadd.s32 1, %s815_s11  ;;  %s514_s30 = sshll.u32 %s1140_s23, 1 }
  0x16   : > { %s68_s3 = ssub.s32 %s843_s18, %s1140_s23  ;;  %s41_s4 = sadd.s32 %s514_s30, %s1136_s22 }
  0x17   : > { %p69_p8 = scmp.eq.s32.totalorder %s68_s3, 0  ;;  %s42_s5 = ssub.s32 %s934_s25, %s41_s4 }
  0x18   : > { %p81_p9 = scmp.ne.s32.totalorder %s815_s11, %s811_s10  ;;  %p43_p10 = scmp.eq.s32.totalorder %s42_s5, 0 }
  0x19   : > { %p82_p11 = scmp.eq.s32.totalorder %s511_s20, 3  ;;  %p87_p13 = scmp.ne.s32.totalorder %s811_s10, %s807_s9 }
  0x1a   : > { %s963_s6 = scalar_select %p69_p8, %s815_s11, %s71_s29  }
  0x1b   : > { %s966_s7 = scalar_select %p43_p10, %s827_s14, %s45_s26  }
  0x1c   : > { %p968_p12 = por %p82_p11, %p81_p9  ;;  %p88_p0 = scmp.eq.s32.totalorder %s512_s21, 3 }
  0x1d   : > { %p567_p1 = scmp.lt.s32.totalorder %s847_s19, 4  ;;  %s134_s12 = sand.u32 1, %s827_s14  }
  0x1e   : > { %p978_p2 = por %p88_p0, %p87_p13  ;;  %s517_s30 = sshll.u32 %s134_s12, 4 }
  0x1f   : > { %s519_s20 = sshll.u32 %s934_s25, 7  ;;  %s138_s4 = scalar_lea.vmem [#allocation2], %s517_s30 }
  0x20   : > { %s145_s26 = scalar_lea.hbm %s1111_s0, %s519_s20  ;;  %s146_s5 = sshll.u32 %s138_s4, 4  ;;  %s147_s5 = int_to_ptr.vmem [resolvable:$true] %s146_s5 }
  0x21   : > { %p988_p3 = pnand %p567_p1, %p944_p5  ;;  %p520_p4 = scmp.ge.s32.totalorder %s847_s19, 1 }
  0x22   : > { %s135_s21 = scalar_lea.sflag [#allocation3], %s134_s12  ;;  %s682_s22 = scalar_lea.vmem %s147_s5, 256 }
  0x23   : > { %p671_p6 = pneg %p988_p3  ;;  %p683_p8 = scmp.ne.s32.totalorder %s147_s5, %s682_s22 }
  0x24   : > { %s849_s25 = smov [#allocation2]  }
  0x25   : > { %p685_p9 = pnand %p683_p8, %p671_p6  ;;  %s687_s3 = sshll.u32 %s849_s25, 4  ;;  %s688_s3 = int_to_ptr.vmem [resolvable:$false] %s687_s3 }
  0x26   : > { %s689_s30 = scalar_lea.vmem %s688_s3, 512  ;;  %p690_p11 = scmp.lt.s32.totalorder %s147_s5, %s688_s3 }
  0x27   : > { %p686_p10 = pneg %p685_p9  ;;  %p691_p13 = scmp.lt.s32.totalorder %s689_s30, %s682_s22 }
  0x29   : > { %p692_p5 = por %p691_p13, %p690_p11 }
  0x2b   : > { %p693_p0 = pnand %p692_p5, %p686_p10 }
  0x2d   : > { %696 = shalt.err (!%p693_p0)
}
  0x2e   : > { %s850_s27 = smov 512   ;;  %s851_s12 = smov 128  }
  0x2f   : > { %s852_s20 = smov 8   ;;  %p154_p1 = scmp.lt.s32.totalorder %s847_s19, 5 }
  0x30   : > { %559 = dma.hbm_to_vmem [thread:$0]  (!%p988_p3), %s145_s26, 256, %s147_s5, %s135_s21, %s850_s27, %s851_s12, %s852_s20  }
  0x31   : > { %p155_p6 = pnand %p520_p4, %p154_p1 }
  0x32   : > { %s160_s29 = sand.u32 (!%p155_p6), 1, %s823_s13  }
  0x33   : > { %158 = sbr.rel (%p155_p6) target bundleno = 303 (0x12f), region = 24  ;;  %s521_s4 = sshll.u32 (!%p155_p6), %s160_s29, 4 }
  0x34   : > { %s161_s22 = scalar_lea.sflag (!%p155_p6), [#allocation3], %s160_s29  ;;  %s164_s25 = scalar_lea.vmem (!%p155_p6), [#allocation2], %s521_s4 }
  0x38   : > { %794 = dma.done.wait (%p950_p7), %s161_s22, 256  }
  0x39   : > { %796 = vsyncadd (%p950_p7), %s161_s22, 4294967040  ;;  %s1006_s3 = sand.u32 1, %s811_s10   ;;  %p523_p3 = scmp.ne.s32.totalorder %s831_s15, 0 }
  0x3a   : > { %s522_s23 = sshll.u32 %s1006_s3, 4  ;;  %s1010_s26 = scalar_lea.vmem [#allocation5], %s1006_s3 }
  0x3b   : > { %s1012_s5 = scalar_lea.vmem [#allocation6], %s522_s23  ;;  %195 = sbr.rel (%p523_p3) target bundleno = 67 (0x43), region = 32 }
  0x40   : > { %vm197_vm0 = vcmask 64512   ;;  %v853_v0 = vmov 0.0  }
  0x41   : > { %196 = vst [vmem:[%s1010_s26] sm:$0x1] %v853_v0  ;;  %198 = vst.msk [vmem:[%s1012_s5] sm:$0xff] %vm197_vm0, %v853_v0 }
  0x42   : > { %199 = vst.msk [vmem:[%s1012_s5 + $0x8] sm:$0xff] %vm197_vm0, %v853_v0 }
  0x43 PF: > { %v200_v1 = vld [vmem:[%s164_s25] sm:$0xff]  ;;  %v524_v2 = vld [vmem:[%s164_s25 + $0x8] sm:$0xff]  ;;  %v854_v3 = vmov 0.0   ;;  %vm855_vm1 = vmmov 0   ;;  %s528_s15 = sshll.u32 %s835_s16, 4  ;;  %s384_s28 = sshll.u32 %s1010_s26, 4  ;;  %s385_s28 = int_to_ptr.vmem [resolvable:$true] %s384_s28 }
  0x44   : > { %538 = vmatprep.subr.bf16.mxu0 %v854_v3  ;;  %544 = vmatprep.subr.bf16.mxu1 %v854_v3  ;;  %v211_v4 = vrot.slane %v200_v1, 4  ;;  %v203_v5 = vsub.f32 %v200_v1, %v524_v2  ;;  %v220_v6 = vrot.slane %v524_v2, 4  ;;  %s382_s27 = scalar_lea.hbm %s1112_s1, %s528_s15  ;;  %s367_s12 = scalar_lea.sflag [#allocation4], %s1006_s3 }
  0x45   : > { %540 = vmatprep.mubr.msk.bf16.mxu0 %vm855_vm1, %v854_v3  ;;  %546 = vmatprep.mubr.msk.bf16.mxu1 %vm855_vm1, %v854_v3  ;;  %s697_s20 = scalar_lea.vmem %s385_s28, 16  ;;  %s856_s29 = smov [#allocation5]  }
  0x46   : > { %v212_v7 = vadd.f32 %v211_v4, %v200_v1  ;;  %v221_v8 = vadd.f32 %v524_v2, %v220_v6  ;;  %v204_v41 = vmul.f32 %v203_v5, %v203_v5  ;;  %p698_p7 = scmp.ne.s32.totalorder %s385_s28, %s697_s20  ;;  %s701_s4 = sshll.u32 %s856_s29, 4  ;;  %s702_s4 = int_to_ptr.vmem [resolvable:$false] %s701_s4 }
  0x47   : > { %s703_s22 = scalar_lea.vmem %s702_s4, 32  ;;  %p704_p9 = scmp.lt.s32.totalorder %s385_s28, %s702_s4 }
  0x48   : > { %v213_v9 = vrot.slane %v212_v7, 2  ;;  %v222_v10 = vrot.slane %v221_v8, 2  ;;  %v205_v42 = vrot.slane %v204_v41, 4  ;;  %p699_p4 = pnand %p698_p7, %p968_p12  ;;  %p705_p10 = scmp.lt.s32.totalorder %s703_s22, %s697_s20 }
  0x4a   : > { %v214_v11 = vadd.f32 %v213_v9, %v212_v7  ;;  %v223_v12 = vadd.f32 %v222_v10, %v221_v8  ;;  %v206_v45 = vadd.f32 %v205_v42, %v204_v41  ;;  %v273_v7 = vld [vmem:[%s1010_s26] sm:$0x1]  ;;  %p700_p8 = pneg %p699_p4  ;;  %p706_p11 = por %p705_p10, %p704_p9 }
  0x4c   : > { %v215_v13 = vrot.slane %v214_v11, 1  ;;  %v224_v14 = vrot.slane %v223_v12, 1  ;;  %v207_v50 = vrot.slane %v206_v45, 2  ;;  %p707_p13 = pnand %p706_p11, %p700_p8 }
  0x4e   : > { %v216_v15 = vadd.f32 %v215_v13, %v214_v11  ;;  %v225_v16 = vadd.f32 %v224_v14, %v223_v12  ;;  %v208_v54 = vadd.f32 %v207_v50, %v206_v45 }
  0x50   : > { %v218_v17 = vmul.f32 0.125, %v216_v15  ;;  %v226_v18 = vmul.f32 0.125, %v225_v16  ;;  %v209_v58 = vrot.slane %v208_v54, 1 }
  0x52   : > { %v219_v19 = vsub.f32 %v200_v1, %v218_v17  ;;  %v227_v20 = vsub.f32 %v524_v2, %v226_v18  ;;  %v210_v61 = vadd.f32 %v209_v58, %v208_v54 }
  0x54   : > { %v276_v21 = vpack.c.bf16 %v219_v19, %v219_v19  ;;  %v277_v22 = vpack.c.bf16 %v227_v20, %v227_v20  ;;  %v228_v23 = vmul.f32 %v219_v19, %v219_v19  ;;  %v235_v24 = vmul.f32 %v227_v20, %v227_v20 }
  0x55   : > { %v268_v2 = vmul.f32 0.0061035156, %v210_v61 }
  0x56   : > { %539 = vmatpush3.bf16.xpose.msra.mxu0 %v276_v21  ;;  %545 = vmatpush3.bf16.xpose.msra.mxu1 %v277_v22  ;;  %v229_v25 = vrot.slane %v228_v23, 4  ;;  %v236_v26 = vrot.slane %v235_v24, 4 }
  0x58   : > { %v230_v27 = vadd.f32 %v229_v25, %v228_v23  ;;  %v237_v28 = vadd.f32 %v236_v26, %v235_v24 }
  0x5a   : > { %v231_v29 = vrot.slane %v230_v27, 2  ;;  %v238_v30 = vrot.slane %v237_v28, 2 }
  0x5c   : > { %v232_v31 = vadd.f32 %v231_v29, %v230_v27  ;;  %v239_v32 = vadd.f32 %v238_v30, %v237_v28 }
  0x5d   : > { %541 = vmatmul.mubr.bf16.vlgmr.msra.gmra.mxu0 %v276_v21  ;;  %547 = vmatmul.mubr.bf16.vlgmr.msra.gmra.mxu1 %v277_v22 }
  0x5e   : > { %v233_v33 = vrot.slane %v232_v31, 1  ;;  %v240_v34 = vrot.slane %v239_v32, 1 }
  0x60   : > { %v234_v35 = vadd.f32 %v233_v33, %v232_v31  ;;  %v241_v36 = vadd.f32 %v240_v34, %v239_v32 }
  0x62   : > { %v242_v37 = vmul.f32 0.14285715, %v234_v35  ;;  %v251_v38 = vmul.f32 0.14285715, %v241_v36  ;;  %v265_v62 = vmul.f32 %v234_v35, %v234_v35  ;;  %v266_v63 = vmul.f32 %v241_v36, %v241_v36 }
  0x64   : > { %v243_v39 = vadd.f32 0.0001, %v242_v37  ;;  %v252_v40 = vadd.f32 0.0001, %v251_v38  ;;  %v267_v1 = vadd.f32 %v266_v63, %v265_v62 }
  0x66   : > { %665 = vrsqrt.f32 %v243_v39  ;;  %vm246_vm2 = vcmp.eq.f32.partialorder %v243_v39, inf  ;;  %v249_v48 = vand.u32 2147483648, %v243_v39  ;;  %vm255_vm3 = vcmp.eq.f32.partialorder %v252_v40, inf }
  0x67   : > { %667 = vrsqrt.f32 %v252_v40  ;;  %v258_v49 = vand.u32 2147483648, %v252_v40  ;;  %vm248_vm4 = vcmp.eq.f32.partialorder %v243_v39, 0.0  ;;  %vm257_vm5 = vcmp.eq.f32.partialorder %v252_v40, 0.0 }
  0x68   : > { %v271_v4 = vmul.f32 3.7122232e-14, %v267_v1 }
  0x73   : > { %v666_v43 = vpop.eup %665 }
  0x74   : > { %v668_v44 = vpop.eup %667  ;;  %v245_v46 = vmul.f32 %v666_v43, %v243_v39 }
  0x75   : > { %v254_v47 = vmul.f32 %v668_v44, %v252_v40 }
  0x76   : > { %v247_v51 = vsel %vm246_vm2, %v243_v39, %v245_v46 }
  0x77   : > { %v256_v52 = vsel %vm255_vm3, %v252_v40, %v254_v47  ;;  %v250_v53 = vsel %vm248_vm4, %v249_v48, %v247_v51 }
  0x78   : > { %v259_v55 = vsel %vm257_vm5, %v258_v49, %v256_v52  ;;  %v260_v56 = vsub.f32 1.0, %v250_v53 }
  0x79   : > { %v262_v57 = vsub.f32 1.0, %v259_v55 }
  0x7a   : > { %v261_v59 = vmax.f32 %v260_v56, 0.0 }
  0x7b   : > { %v263_v60 = vmax.f32 %v262_v57, 0.0 }
  0x7d   : > { %v264_v0 = vadd.f32 %v263_v60, %v261_v59 }
  0x7f   : > { %v269_v3 = vmul.f32 0.024414063, %v264_v0 }
  0x81   : > { %v270_v5 = vadd.f32 %v269_v3, %v268_v2 }
  0x83   : > { %v272_v6 = vsub.f32 %v270_v5, %v271_v4 }
  0x85   : > { %v274_v8 = vadd.f32 %v273_v7, %v272_v6 }
  0x87   : > { %275 = vst [vmem:[%s1010_s26] sm:$0x1] %v274_v8 }
  0x88   : > { %710 = shalt.err (!%p707_p13)
}
  0x89   : > { %s711_s25 = scalar_lea.hbm %s382_s27, 16  ;;  %s715_s15 = scalar_lea.hbm %s1112_s1, 32 }
  0x8a   : > { %p712_p5 = scmp.ne.s32.totalorder %s382_s27, %s711_s25  ;;  %p716_p6 = scmp.lt.s32.totalorder %s382_s27, %s1112_s1 }
  0x8b   : > { %p717_p3 = scmp.lt.s32.totalorder %s715_s15, %s711_s25 }
  0x8c   : > { %p713_p0 = pnand %p712_p5, %p968_p12 }
  0x8d   : > { %p718_p7 = por %p717_p3, %p716_p6 }
  0x8e   : > { %p714_p1 = pneg %p713_p0 }
  0x90   : > { %p719_p4 = pnand %p718_p7, %p714_p1 }
  0x92   : > { %722 = shalt.err (!%p719_p4)
}
  0x93   : > { %552 = dma.vmem_to_hbm [thread:$0]  (%p968_p12), %s385_s28, 16, %s382_s27, %s367_s12   ;;  %v278_v9 = vld [vmem:[%s1012_s5] sm:$0xff]  ;;  %v525_v10 = vld [vmem:[%s1012_s5 + $0x8] sm:$0xff]  ;;  %vm320_vm6 = vcmask 64512  }
  0x94   : > { %s533_s20 = sshll.u32 %s835_s16, 8  ;;  %s397_s29 = sshll.u32 %s1012_s5, 4  ;;  %s1047_s29 = int_to_ptr.vmem [resolvable:$true] %s397_s29 }
  0x95   : > { %s1045_s25 = scalar_lea.hbm %s1113_s2, %s533_s20  ;;  %s371_s16 = scalar_lea.sflag [#allocation7], %s1006_s3 }
  0x96   : > { %s723_s28 = scalar_lea.vmem %s1047_s29, 256  ;;  %s857_s27 = smov [#allocation6]  }
  0x97   : > { %p724_p8 = scmp.ne.s32.totalorder %s1047_s29, %s723_s28  ;;  %s727_s12 = sshll.u32 %s857_s27, 4  ;;  %s728_s12 = int_to_ptr.vmem [resolvable:$false] %s727_s12 }
  0x98   : > { %s729_s23 = scalar_lea.vmem %s728_s12, 512  ;;  %p730_p11 = scmp.lt.s32.totalorder %s1047_s29, %s728_s12 }
  0x99   : > { %p725_p9 = pnand %p724_p8, %p968_p12  ;;  %p731_p13 = scmp.lt.s32.totalorder %s729_s23, %s723_s28 }
  0x9b   : > { %p726_p10 = pneg %p725_p9  ;;  %p732_p5 = por %p731_p13, %p730_p11 }
  0x9d   : > { %p733_p0 = pnand %p732_p5, %p726_p10 }
 0x11d   : > { %v313_v11 = vpop.f32.mrf.mxu0  ;;  %v358_v12 = vpop.f32.mrf.mxu1 }
 0x11e   : > { %v319_v13 = vadd.f32 %v313_v11, %v278_v9  ;;  %v364_v14 = vadd.f32 %v525_v10, %v358_v12 }
 0x11f   : > { %v542_v15 = vpop.f32.mrf.mxu0  ;;  %v548_v16 = vpop.f32.mrf.mxu1 }
 0x120   : > { %321 = vst.msk [vmem:[%s1012_s5] sm:$0xff] %vm320_vm6, %v319_v13  ;;  %526 = vst.msk [vmem:[%s1012_s5 + $0x8] sm:$0xff] %vm320_vm6, %v364_v14 }
 0x121   : > { %v316_v17 = vpop.f32.mrf.mxu0  ;;  %v361_v18 = vpop.f32.mrf.mxu1 }
 0x122   : > { %736 = shalt.err (!%p733_p0)
}
 0x123   : > { %s737_s5 = scalar_lea.hbm %s1045_s25, 256  ;;  %s741_s21 = scalar_lea.hbm %s1113_s2, 512 }
 0x124   : > { %p738_p1 = scmp.ne.s32.totalorder %s1045_s25, %s737_s5  ;;  %p742_p7 = scmp.lt.s32.totalorder %s1045_s25, %s1113_s2 }
 0x125   : > { %p743_p4 = scmp.lt.s32.totalorder %s741_s21, %s737_s5 }
 0x126   : > { %p739_p6 = pnand %p738_p1, %p968_p12 }
 0x127   : > { %p744_p8 = por %p743_p4, %p742_p7 }
 0x128   : > { %p740_p3 = pneg %p739_p6 }
 0x12a   : > { %p745_p9 = pnand %p744_p8, %p740_p3 }
 0x12c   : > { %748 = shalt.err (!%p745_p9)
}
 0x12d   : > { %s858_s4 = smov 128   ;;  %s859_s22 = smov 8   ;;  %v543_v19 = vpop.f32.mrf.mxu0  ;;  %v549_v20 = vpop.f32.mrf.mxu1 }
 0x12e   : > { %553 = dma.vmem_to_hbm [thread:$0]  (%p968_p12), %s1047_s29, 256, %s1045_s25, %s371_s16, %s858_s4, %s858_s4, %s859_s22  }
 0x12f PF: > { %p568_p10 = scmp.ge.s32.totalorder %s847_s19, 2  ;;  %s412_s28 = sand.u32 1, %s807_s9  }
 0x130   : > { %s413_s27 = scalar_lea.sflag [#allocation4], %s412_s28 }
 0x131   : > { %p561_p11 = pnand %p568_p10, %p978_p2 }
 0x133   : > { %p562_p13 = pneg %p561_p11 }
 0x135   : > { %798 = dma.done.wait (%p562_p13), %s413_s27, 16  }
 0x136   : > { %800 = vsyncadd (%p562_p13), %s413_s27, 4294967280  ;;  %s421_s12 = scalar_lea.sflag [#allocation7], %s412_s28 }
 0x137   : > { %802 = dma.done.wait (%p562_p13), %s421_s12, 256  }
 0x138   : > { %804 = vsyncadd (%p562_p13), %s421_s12, 4294967040  ;;  %s22_s19 = sadd.s32 1, %s847_s19   ;;  %s1123_s8 = sld [smem:[#allocation11_spill]] }
 0x139   : > { %p19_p12 = scmp.ge.s32.totalorder %s22_s19, 6   ;;  %s1124_s24 = sld [smem:[#allocation12_spill]] }
 0x13a   : > { %s1125_s9 = smov %s811_s10  ;;  %s1126_s10 = smov %s815_s11 }
 0x13b   : > { %s1127_s11 = smov %s963_s6  ;;  %s1128_s12 = smov %s823_s13 }
 0x13c   : > { %s1129_s13 = smov %s827_s14  ;;  %s1130_s14 = smov %s966_s7 }
 0x13d   : > { %s1131_s15 = smov %s839_s17  ;;  %s1132_s16 = smov %s843_s18 }
 0x13e   : > { %s1133_s17 = smov %s1123_s8  ;;  %21 = sbr.rel (!%p19_p12) target bundleno = 11 (0xb), region = 92 }
 0x13f   : > { %s1134_s18 = smov %s1124_s24 }
 0x143   :  { %426 = vsyncpa [#allocation3], 1 }
 0x144   :  { %428 = vsyncpa [#allocation3 + $0x1], 1 }
 0x145   :  { %429 = vsyncpa [#allocation4], 1 }
 0x146   :  { %431 = vsyncpa [#allocation4 + $0x1], 1 }
 0x147   :  { %432 = vsyncpa [#allocation7], 1 }
 0x148   :  { %434 = vsyncpa [#allocation7 + $0x1], 1 }

</bundles_post_ra>
